<compile_context>
chip_gen: v6e
topology: v6e:2x2x1
jax: 0.10.0
libtpu: 0.0.40
codegen_flags: <defaults>
</compile_context>

<pallas_src>
import functools
import math

import jax
import jax.numpy as jnp
from jax.experimental import pallas as pl
from jax.experimental.pallas import tpu as pltpu


# Batch tile.  With <=128-lane activations a (2048, 128) f32 working set is ~1 MiB,
# so even with double-buffered input/output tiles this stays far below the
# per-generation VMEM budget while amortizing per-grid-step overhead.
TILE_B = 2048


def _round_up(x, m):
    return int(pl.cdiv(x, m) * m)


def _vmem_limit_bytes():
    """Per-generation scoped-VMEM budget: ~3/4 of physical, capped at 96 MiB.

    v5e/v6e (128 MiB physical) -> 96 MiB; v7x (64 MiB per TC) -> 48 MiB.
    Falls back to a v7x-safe 48 MiB if the hardware query is unavailable.
    """
    try:
        cap = getattr(pltpu.get_tpu_info(), "vmem_capacity_bytes", None)
        if cap:
            return int(min(cap * 3 // 4, 96 * 1024 * 1024))
    except Exception:
        pass
    return 48 * 1024 * 1024


def _gelu_exact(y):
    # nn.GELU() default = exact erf-based GELU (computed in f32).
    inv_sqrt2 = jnp.float32(1.0 / math.sqrt(2.0))
    return 0.5 * y * (1.0 + jax.lax.erf(y * inv_sqrt2))


def _fused_mlp_kernel(*refs, n_layers):
    """Entire MLP for one batch tile: (split-)Linear + GELU per layer, Sigmoid at the end.

    refs = (h_ref, r_ref, w0h, w0r, b0, w1, b1, ..., o_ref)
    Weights/biases use constant index_maps (VMEM-resident across grid steps);
    activations never leave VMEM/vregs.
    """
    h_ref, r_ref = refs[0], refs[1]
    o_ref = refs[-1]
    params = refs[2:-1]

    # bf16 operands into the MXU (native on v5e/v6e/v7x); accumulate in f32.
    h = h_ref[...].astype(jnp.bfloat16)
    r = r_ref[...].astype(jnp.bfloat16)

    # Layer 0 with fused concat: concat([h, r]) @ W0 == h @ W0[:D1] + r @ W0[D1:]
    w0h = params[0][...]        # bf16
    w0r = params[1][...]        # bf16
    b0 = params[2][...]         # f32, [1, Dout_pad]
    y = jnp.dot(h, w0h, preferred_element_type=jnp.float32)
    y = y + jnp.dot(r, w0r, preferred_element_type=jnp.float32)
    y = _gelu_exact(y + b0)     # dropout == identity (inference mode)

    idx = 3
    for _ in range(1, n_layers):
        w = params[idx][...]            # bf16
        b = params[idx + 1][...]        # f32
        idx += 2
        y = jnp.dot(y.astype(jnp.bfloat16), w, preferred_element_type=jnp.float32) + b
        y = _gelu_exact(y)

    # Sigmoid = 1 / (1 + exp(-y)): exp and approx reciprocal both run on the EUP,
    # keeping the divide off the (binding) VALU slot.
    y = pl.reciprocal(1.0 + jnp.exp(-y), approx=True)
    o_ref[...] = y.astype(o_ref.dtype)


def pad_params(weights, biases, d_hidden, weight_dtype=jnp.bfloat16):
    """One-time parameter prep (hoisted out of the hot path).

    - Splits layer-0 weight at row d_hidden so the concat can be fused into the kernel.
    - Zero-pads every layer's output width to a multiple of 128 lanes (and the matching
      input rows of the next layer) -> lane-dense MXU tiles and HBM stores.  Padded
      columns produce GELU(0) = 0, so they never pollute downstream layers.
    - Stores weights in bf16 (MXU-native operand dtype); biases stay f32 as [1, Dout_pad].

    Returns (flat_params, out_dim) where flat_params = [w0h, w0r, b0, w1, b1, ...].
    """
    out_dims = [w.shape[1] for w in weights]
    pad_out = [_round_up(d, 128) for d in out_dims]
    flat = []
    for k, (w, b) in enumerate(zip(weights, biases)):
        din, dout = w.shape
        dout_p = pad_out[k]
        din_p = din if k == 0 else pad_out[k - 1]
        w_p = jnp.zeros((din_p, dout_p), weight_dtype).at[:din, :dout].set(
            w.astype(weight_dtype))
        b_p = jnp.zeros((1, dout_p), jnp.float32).at[0, :dout].set(
            b.astype(jnp.float32))
        if k == 0:
            # TODO(synk): when D1+D2 <= 128 a single merged layer-0 weight (in-kernel
            # concat) would halve layer-0 MXU pushes; kept split for robustness.
            flat += [w_p[:d_hidden], w_p[d_hidden:], b_p]
        else:
            flat += [w_p, b_p]
    return flat, out_dims[-1]


def context_target_mlp(hidden_state, predicted_read, flat_params, out_dim, out_dtype=None):
    """Full forward pass in a single fused pallas_call.

    hidden_state: [B, D1], predicted_read: [B, D2], flat_params from pad_params().
    """
    B, D1 = hidden_state.shape
    _, D2 = predicted_read.shape
    out_dtype = out_dtype or hidden_state.dtype
    n_layers = (len(flat_params) - 1) // 2
    dout_p = flat_params[-1].shape[1]  # padded final width (multiple of 128)

    # Batch tiling WITHOUT any wrapper-side padding (no extra HBM pass):
    # the last block may be ragged; OOB rows are read as garbage and discarded on
    # store, which is safe because every row is independent (no cross-row reduction).
    TB = min(TILE_B, _round_up(B, 8))
    # v7x has 2 TensorCores: when B allows, keep >= 2 batch tiles so the
    # "parallel" grid axis actually shards across both cores.
    if B > 8 and pl.cdiv(B, TB) < 2:
        TB = _round_up(pl.cdiv(B, 2), 8)
    grid = (pl.cdiv(B, TB),)

    in_specs = [
        pl.BlockSpec((TB, D1), lambda i: (i, 0)),
        pl.BlockSpec((TB, D2), lambda i: (i, 0)),
    ]
    # Weights/biases: constant block index -> fetched once, VMEM-resident across
    # all grid steps (bf16 weights halve their footprint vs the f32 version).
    for p in flat_params:
        in_specs.append(pl.BlockSpec(p.shape, lambda i: (0, 0)))

    out = pl.pallas_call(
        functools.partial(_fused_mlp_kernel, n_layers=n_layers),
        out_shape=jax.ShapeDtypeStruct((B, dout_p), out_dtype),
        grid=grid,
        in_specs=in_specs,
        out_specs=pl.BlockSpec((TB, dout_p), lambda i: (i, 0)),
        compiler_params=pltpu.CompilerParams(
            dimension_semantics=("parallel",),      # shards batch tiles across TCs on v7x
            vmem_limit_bytes=_vmem_limit_bytes(),   # per-generation budget (v5e/v6e/v7x)
        ),
    )(hidden_state, predicted_read, *flat_params)

    # Only the padded lanes are sliced off (batch dim is already exactly B).
    # If the consumer can accept the lane-padded [B, dout_p] layout, return `out` as-is.
    return out[:, :out_dim]


def init_params(hidden_sizes, key):
    """Deterministic init mimicking nn.Linear's uniform(-1/sqrt(fan_in), 1/sqrt(fan_in))."""
    weights, biases = [], []
    for k in range(len(hidden_sizes) - 1):
        fan_in, fan_out = hidden_sizes[k], hidden_sizes[k + 1]
        key, kw, kb = jax.random.split(key, 3)
        bound = 1.0 / math.sqrt(fan_in)
        # stored as [in, out] (transpose of PyTorch's [out, in])
        weights.append(jax.random.uniform(kw, (fan_in, fan_out), jnp.float32, -bound, bound))
        biases.append(jax.random.uniform(kb, (fan_out,), jnp.float32, -bound, bound))
    return weights, biases


def reference_forward(hidden_state, predicted_read, weights, biases):
    """Pure-JAX f32 reference (unpadded params) for the correctness check."""
    x = jnp.concatenate([hidden_state, predicted_read], axis=1)
    for w, b in zip(weights, biases):
        x = jax.nn.gelu(x @ w + b, approximate=False)
    return jax.nn.sigmoid(x)


if __name__ == "__main__":
    key = jax.random.PRNGKey(0)
    k1, k2, k3 = jax.random.split(key, 3)

    B = 2
    d_hidden, d_read = 16, 16
    hidden_sizes = [d_hidden + d_read, 64, 32]   # concat dim must equal hidden_sizes[0]

    hidden_state = jax.random.normal(k1, (B, d_hidden), jnp.float32)
    predicted_read = jax.random.normal(k2, (B, d_read), jnp.float32)
    weights, biases = init_params(hidden_sizes, k3)

    # One-time parameter prep (concat-split + 128-lane padding + bf16 weights).
    flat_params, out_dim = pad_params(weights, biases, d_hidden)

    out = context_target_mlp(hidden_state, predicted_read, flat_params, out_dim)
    out = jax.block_until_ready(out)

    ref = reference_forward(hidden_state, predicted_read, weights, biases)
    assert out.shape == (B, hidden_sizes[-1])
    # bf16 MXU operands (f32 accumulation) vs the f32 reference -> loose-ish tolerance.
    assert jnp.allclose(out, ref, atol=2e-2, rtol=2e-2), "mismatch vs pure-JAX reference"

    print("KERNEL_OK")
</pallas_src>

<mosaic_0001>
module attributes {stable_mosaic.version = 11 : i64} {
  func.func @_fused_mlp_kernel(%arg0: i32, %arg1: memref<8x16xf32, #tpu.memory_space<vmem>>, %arg2: memref<8x16xf32, #tpu.memory_space<vmem>>, %arg3: memref<16x128xbf16, #tpu.memory_space<vmem>>, %arg4: memref<16x128xbf16, #tpu.memory_space<vmem>>, %arg5: memref<1x128xf32, #tpu.memory_space<vmem>>, %arg6: memref<128x128xbf16, #tpu.memory_space<vmem>>, %arg7: memref<1x128xf32, #tpu.memory_space<vmem>>, %arg8: memref<8x128xf32, #tpu.memory_space<vmem>>) attributes {dimension_semantics = [#tpu.dimension_semantics<parallel>], iteration_bounds = array<i64: 1>, scalar_prefetch = 0 : i64, scratch_operands = 0 : i64, tpu.core_type = #tpu.core_type<tc>, window_params = [{transform_indices = @transform_0, window_bounds = array<i64: 8, 16>}, {transform_indices = @transform_1, window_bounds = array<i64: 8, 16>}, {pipeline_mode = #tpu.pipeline_mode<synchronous>, transform_indices = @transform_2, window_bounds = array<i64: 16, 128>}, {pipeline_mode = #tpu.pipeline_mode<synchronous>, transform_indices = @transform_3, window_bounds = array<i64: 16, 128>}, {pipeline_mode = #tpu.pipeline_mode<synchronous>, transform_indices = @transform_4, window_bounds = array<i64: 1, 128>}, {pipeline_mode = #tpu.pipeline_mode<synchronous>, transform_indices = @transform_5, window_bounds = array<i64: 128, 128>}, {pipeline_mode = #tpu.pipeline_mode<synchronous>, transform_indices = @transform_6, window_bounds = array<i64: 1, 128>}, {transform_indices = @transform_7, window_bounds = array<i64: 8, 128>}]} {
    %c0 = arith.constant 0 : index
    %c0_0 = arith.constant 0 : index
    %0 = vector.load %arg1[%c0, %c0_0] : memref<8x16xf32, #tpu.memory_space<vmem>>, vector<8x16xf32>
    %1 = arith.truncf %0 : vector<8x16xf32> to vector<8x16xbf16>
    %c0_1 = arith.constant 0 : index
    %c0_2 = arith.constant 0 : index
    %2 = vector.load %arg2[%c0_1, %c0_2] : memref<8x16xf32, #tpu.memory_space<vmem>>, vector<8x16xf32>
    %3 = arith.truncf %2 : vector<8x16xf32> to vector<8x16xbf16>
    %c0_3 = arith.constant 0 : index
    %c0_4 = arith.constant 0 : index
    %4 = vector.load %arg3[%c0_3, %c0_4] : memref<16x128xbf16, #tpu.memory_space<vmem>>, vector<16x128xbf16>
    %c0_5 = arith.constant 0 : index
    %c0_6 = arith.constant 0 : index
    %5 = vector.load %arg4[%c0_5, %c0_6] : memref<16x128xbf16, #tpu.memory_space<vmem>>, vector<16x128xbf16>
    %c0_7 = arith.constant 0 : index
    %c0_8 = arith.constant 0 : index
    %6 = vector.load %arg5[%c0_7, %c0_8] : memref<1x128xf32, #tpu.memory_space<vmem>>, vector<1x128xf32>
    %cst = arith.constant dense<0.000000e+00> : vector<8x128xf32>
    %7 = tpu.matmul %1, %4, %cst {dimension_numbers = #tpu.dot_dimension_numbers<[1], [0], [0], [1], [0, 0, 1, 1], [], []>} : vector<8x16xbf16>, vector<16x128xbf16>, vector<8x128xf32> -> vector<8x128xf32>
    %cst_9 = arith.constant dense<0.000000e+00> : vector<8x128xf32>
    %8 = tpu.matmul %3, %5, %cst_9 {dimension_numbers = #tpu.dot_dimension_numbers<[1], [0], [0], [1], [0, 0, 1, 1], [], []>} : vector<8x16xbf16>, vector<16x128xbf16>, vector<8x128xf32> -> vector<8x128xf32>
    %9 = arith.addf %7, %8 : vector<8x128xf32>
    %10 = vector.broadcast %6 : vector<1x128xf32> to vector<8x128xf32>
    %11 = arith.addf %9, %10 : vector<8x128xf32>
    %cst_10 = arith.constant 5.000000e-01 : f32
    %12 = vector.broadcast %cst_10 : f32 to vector<8x128xf32>
    %13 = arith.mulf %12, %11 : vector<8x128xf32>
    %cst_11 = arith.constant 0.707106769 : f32
    %14 = vector.broadcast %cst_11 : f32 to vector<8x128xf32>
    %15 = arith.mulf %11, %14 : vector<8x128xf32>
    %16 = math.erf %15 : vector<8x128xf32>
    %cst_12 = arith.constant 1.000000e+00 : f32
    %17 = vector.broadcast %cst_12 : f32 to vector<8x128xf32>
    %18 = arith.addf %17, %16 : vector<8x128xf32>
    %19 = arith.mulf %13, %18 : vector<8x128xf32>
    %c0_13 = arith.constant 0 : index
    %c0_14 = arith.constant 0 : index
    %20 = vector.load %arg6[%c0_13, %c0_14] : memref<128x128xbf16, #tpu.memory_space<vmem>>, vector<128x128xbf16>
    %c0_15 = arith.constant 0 : index
    %c0_16 = arith.constant 0 : index
    %21 = vector.load %arg7[%c0_15, %c0_16] : memref<1x128xf32, #tpu.memory_space<vmem>>, vector<1x128xf32>
    %22 = arith.truncf %19 : vector<8x128xf32> to vector<8x128xbf16>
    %cst_17 = arith.constant dense<0.000000e+00> : vector<8x128xf32>
    %23 = tpu.matmul %22, %20, %cst_17 {dimension_numbers = #tpu.dot_dimension_numbers<[1], [0], [0], [1], [0, 0, 1, 1], [], []>} : vector<8x128xbf16>, vector<128x128xbf16>, vector<8x128xf32> -> vector<8x128xf32>
    %24 = vector.broadcast %21 : vector<1x128xf32> to vector<8x128xf32>
    %25 = arith.addf %23, %24 : vector<8x128xf32>
    %cst_18 = arith.constant 5.000000e-01 : f32
    %26 = vector.broadcast %cst_18 : f32 to vector<8x128xf32>
    %27 = arith.mulf %26, %25 : vector<8x128xf32>
    %cst_19 = arith.constant 0.707106769 : f32
    %28 = vector.broadcast %cst_19 : f32 to vector<8x128xf32>
    %29 = arith.mulf %25, %28 : vector<8x128xf32>
    %30 = math.erf %29 : vector<8x128xf32>
    %cst_20 = arith.constant 1.000000e+00 : f32
    %31 = vector.broadcast %cst_20 : f32 to vector<8x128xf32>
    %32 = arith.addf %31, %30 : vector<8x128xf32>
    %33 = arith.mulf %27, %32 : vector<8x128xf32>
    %cst_21 = arith.constant 0.000000e+00 : f32
    %34 = vector.broadcast %cst_21 : f32 to vector<8x128xf32>
    %35 = arith.subf %34, %33 : vector<8x128xf32>
    %36 = math.exp %35 : vector<8x128xf32>
    %cst_22 = arith.constant 1.000000e+00 : f32
    %37 = vector.broadcast %cst_22 : f32 to vector<8x128xf32>
    %38 = arith.addf %37, %36 : vector<8x128xf32>
    %39 = tpu.reciprocal %38 {approx = true} : vector<8x128xf32> -> vector<8x128xf32>
    %c0_23 = arith.constant 0 : index
    %c0_24 = arith.constant 0 : index
    %40 = vector.load %arg8[%c0_23, %c0_24] : memref<8x128xf32, #tpu.memory_space<vmem>>, vector<8x128xf32>
    tpu.vector_store %arg8[%c0_23, %c0_24], %39 {strides = array<i32>} : memref<8x128xf32, #tpu.memory_space<vmem>>, vector<8x128xf32>,
    return
  }
  func.func @transform_0(%arg0: i32) -> (i32, i32) {
    %c0_i32 = arith.constant 0 : i32
    %c0_i32_0 = arith.constant 0 : i32
    return %arg0, %c0_i32 : i32, i32
  }
  func.func @transform_1(%arg0: i32) -> (i32, i32) {
    %c0_i32 = arith.constant 0 : i32
    %c0_i32_0 = arith.constant 0 : i32
    return %arg0, %c0_i32 : i32, i32
  }
  func.func @transform_2(%arg0: i32) -> (i32, i32) {
    %c0_i32 = arith.constant 0 : i32
    %c0_i32_0 = arith.constant 0 : i32
    %c0_i32_1 = arith.constant 0 : i32
    return %c0_i32, %c0_i32_0 : i32, i32
  }
  func.func @transform_3(%arg0: i32) -> (i32, i32) {
    %c0_i32 = arith.constant 0 : i32
    %c0_i32_0 = arith.constant 0 : i32
    %c0_i32_1 = arith.constant 0 : i32
    return %c0_i32, %c0_i32_0 : i32, i32
  }
  func.func @transform_4(%arg0: i32) -> (i32, i32) {
    %c0_i32 = arith.constant 0 : i32
    %c0_i32_0 = arith.constant 0 : i32
    %c0_i32_1 = arith.constant 0 : i32
    return %c0_i32, %c0_i32_0 : i32, i32
  }
  func.func @transform_5(%arg0: i32) -> (i32, i32) {
    %c0_i32 = arith.constant 0 : i32
    %c0_i32_0 = arith.constant 0 : i32
    %c0_i32_1 = arith.constant 0 : i32
    return %c0_i32, %c0_i32_0 : i32, i32
  }
  func.func @transform_6(%arg0: i32) -> (i32, i32) {
    %c0_i32 = arith.constant 0 : i32
    %c0_i32_0 = arith.constant 0 : i32
    %c0_i32_1 = arith.constant 0 : i32
    return %c0_i32, %c0_i32_0 : i32, i32
  }
  func.func @transform_7(%arg0: i32) -> (i32, i32) {
    %c0_i32 = arith.constant 0 : i32
    %c0_i32_0 = arith.constant 0 : i32
    return %arg0, %c0_i32 : i32, i32
  }
}

</mosaic_0001>

<bundles_post_ra>
// kernel: tpu_custom_call.1
= control target key start
LH: loop header
LB: loop body
LE: loop exit
PB: predicated region body
PF: predicated region fallthrough
CT: control target
= control target key end

     0   :  { %12 = vsyncpa [#allocation3], 0  ;;  %s660_s0 = inlined_call_operand.hbm [shape: f32[2,16], index: 0, kind: input, shape index: {}]   ;;  %s661_s1 = inlined_call_operand.hbm [shape: f32[2,16], index: 1, kind: input, shape index: {}]   ;;  %s662_s2 = inlined_call_operand.hbm [shape: bf16[16,128], index: 2, kind: input, shape index: {}]   ;;  %s663_s3 = inlined_call_operand.hbm [shape: bf16[16,128], index: 3, kind: input, shape index: {}]   ;;  %s664_s4 = inlined_call_operand.vmem [shape: f32[1,128], index: 4, kind: input, shape index: {}]   ;;  %s665_s5 = inlined_call_operand.hbm [shape: bf16[128,128], index: 5, kind: input, shape index: {}]   ;;  %s666_s6 = inlined_call_operand.vmem [shape: f32[1,128], index: 6, kind: input, shape index: {}]   ;;  %s667_s7 = inlined_call_operand.hbm [shape: f32[2,128], index: 7, kind: output, shape index: {}]  }
   0x1   :  { %13 = vsyncpa [#allocation6], 0 }
   0x2   :  { %14 = vsyncpa [#allocation9], 0 }
   0x3   :  { %15 = vsyncpa [#allocation4], 0 }
   0x4   :  { %20 = vsyncadd [#allocation3], 96  ;;  %s575_s24 = smov [#allocation2]  }
   0x5   :  { %s21_s25 = sshll.u32 %s575_s24, 4  ;;  %s22_s25 = int_to_ptr.vmem [resolvable:$true] %s21_s25 }
   0x6   :  { %s455_s26 = scalar_lea.vmem %s22_s25, 32  ;;  %s459_s27 = scalar_lea.vmem %s22_s25, 128 }
   0x7   :  { %p456_p0 = scmp.ne.s32.totalorder %s22_s25, %s455_s26  ;;  %p460_p1 = scmp.lt.s32.totalorder %s22_s25, %s22_s25 }
   0x8   :  { %p461_p2 = scmp.lt.s32.totalorder %s459_s27, %s455_s26 }
   0xa   :  { %p462_p3 = por %p461_p2, %p460_p1 }
   0xc   :  { %p463_p4 = pnand %p462_p3, %p456_p0 }
   0xe   :  { %466 = shalt.err (!%p463_p4)
}
   0xf   :  { %s576_s28 = smov 32   ;;  %s577_s29 = smov 2  }
  0x10   :  { %27 = dma.hbm_to_vmem [thread:$0]  %s660_s0, 32, %s22_s25, [#allocation3], %s576_s28, %s576_s28, %s577_s29  }
  0x11   :  { %32 = vsyncadd [#allocation6], 96  ;;  %s578_s9 = smov [#allocation5]  }
  0x12   :  { %s33_s10 = sshll.u32 %s578_s9, 4  ;;  %s34_s10 = int_to_ptr.vmem [resolvable:$true] %s33_s10 }
  0x13   :  { %s475_s11 = scalar_lea.vmem %s34_s10, 32  ;;  %s479_s12 = scalar_lea.vmem %s34_s10, 128 }
  0x14   :  { %p476_p5 = scmp.ne.s32.totalorder %s34_s10, %s475_s11  ;;  %p480_p6 = scmp.lt.s32.totalorder %s34_s10, %s34_s10 }
  0x15   :  { %p481_p7 = scmp.lt.s32.totalorder %s479_s12, %s475_s11 }
  0x17   :  { %p482_p8 = por %p481_p7, %p480_p6 }
  0x19   :  { %p483_p9 = pnand %p482_p8, %p476_p5 }
  0x1b   :  { %486 = shalt.err (!%p483_p9)
}
  0x1c   :  { %39 = dma.hbm_to_vmem [thread:$0]  %s661_s1, 32, %s34_s10, [#allocation6], %s576_s28, %s576_s28, %s577_s29  }
  0x1d   :  { %s579_s0 = smov [#allocation8]   ;;  %s580_s16 = smov [#allocation7]  }
  0x1e   :  { %s57_s15 = sshll.u32 %s579_s0, 4  ;;  %s45_s17 = sshll.u32 %s580_s16, 4  ;;  %s58_s15 = int_to_ptr.vmem [resolvable:$true] %s57_s15  ;;  %s46_s17 = int_to_ptr.vmem [resolvable:$true] %s45_s17 }
  0x1f   :  { %s495_s18 = scalar_lea.vmem %s58_s15, 128  ;;  %p500_p11 = scmp.lt.s32.totalorder %s58_s15, %s58_s15 }
  0x20   :  { %p496_p10 = scmp.ne.s32.totalorder %s58_s15, %s495_s18  ;;  %p501_p12 = scmp.lt.s32.totalorder %s495_s18, %s495_s18 }
  0x22   :  { %p502_p13 = por %p501_p12, %p500_p11 }
  0x24   :  { %p503_p0 = pnand %p502_p13, %p496_p10 }
  0x26   :  { %506 = shalt.err (!%p503_p0)
}
  0x27   :  { %s581_s19 = smov 64   ;;  %s582_s20 = smov 4  }
  0x28   :  { %63 = dma.hbm_to_vmem [thread:$0]  %s663_s3, 128, %s58_s15, [#allocation9], %s581_s19, %s581_s19, %s582_s20  }
  0x29   :  { %s515_s1 = scalar_lea.vmem %s46_s17, 128  ;;  %p520_p2 = scmp.lt.s32.totalorder %s46_s17, %s46_s17 }
  0x2a   :  { %p516_p1 = scmp.ne.s32.totalorder %s46_s17, %s515_s1  ;;  %p521_p3 = scmp.lt.s32.totalorder %s515_s1, %s515_s1 }
  0x2c   :  { %p522_p4 = por %p521_p3, %p520_p2 }
  0x2e   :  { %p523_p5 = pnand %p522_p4, %p516_p1 }
  0x30   :  { %526 = shalt.err (!%p523_p5)
}
  0x31   :  { %51 = dma.hbm_to_vmem [thread:$0]  %s662_s2, 128, %s46_s17, [#allocation6], %s581_s19, %s581_s19, %s582_s20  }
  0x32   :  { %s583_s25 = smov [#allocation10]  }
  0x33   :  { %s71_s26 = sshll.u32 %s583_s25, 4  ;;  %s72_s26 = int_to_ptr.vmem [resolvable:$true] %s71_s26 }
  0x34   :  { %s535_s27 = scalar_lea.vmem %s72_s26, 1024  ;;  %p540_p7 = scmp.lt.s32.totalorder %s72_s26, %s72_s26 }
  0x35   :  { %p536_p6 = scmp.ne.s32.totalorder %s72_s26, %s535_s27  ;;  %p541_p8 = scmp.lt.s32.totalorder %s535_s27, %s535_s27 }
  0x37   :  { %p542_p9 = por %p541_p8, %p540_p7 }
  0x39   :  { %p543_p10 = pnand %p542_p9, %p536_p6 }
  0x3b   :  { %546 = shalt.err (!%p543_p10)
}
  0x3c   :  { %77 = dma.hbm_to_vmem [thread:$0]  %s665_s5, 1024, %s72_s26, [#allocation9], %s581_s19, %s581_s19, %s582_s20  }
  0x3d   :  { %567 = dma.done.wait [#allocation3], 128  }
  0x3e   :  { %568 = vsyncadd [#allocation3], 4294967168 }
  0x3f   :  { %569 = dma.done.wait [#allocation6], 256  }
  0x40   :  { %570 = vsyncadd [#allocation6], 4294967040 }
  0x41   :  { %571 = dma.done.wait [#allocation9], 1152  }
  0x42   :  { %572 = vsyncadd [#allocation9], 4294966144  ;;  %v584_v0 = vmov 0.0   ;;  %vm585_vm0 = vmmov 0   ;;  %v429_v1 = vld [vmem:[#allocation8] sm:$0xff]   ;;  %v98_v2 = vld [vmem:[#allocation5] sm:$0xff] }
  0x43   :  { %385 = vmatprep.subr.bf16.mxu1 %v584_v0  ;;  %387 = vmatprep.mubr.msk.bf16.mxu1 %vm585_vm0, %v584_v0  ;;  %v99_v3 = vpack.c.bf16 %v98_v2, %v98_v2  ;;  %vm111_vm1 = vcmask 130048   ;;  %v430_v4 = vld [vmem:[#allocation7] sm:$0xff]   ;;  %v96_v5 = vld [vmem:[#allocation2] sm:$0xff]  ;;  %v431_v7 = vld [vmem:[#allocation10 + $0x38] sm:$0xff]  }
  0x44   :  { %397 = vmatprep.subr.bf16.mxu0 %v584_v0  ;;  %413 = vmatprep.mubr.msk.bf16.mxu0 %vm585_vm0, %v584_v0  ;;  %v97_v6 = vpack.c.bf16 %v96_v5, %v96_v5  ;;  %v432_v8 = vld [vmem:[#allocation10 + $0x30] sm:$0xff]   ;;  %v433_v9 = vld [vmem:[#allocation10 + $0x28] sm:$0xff]   ;;  %v434_v10 = vld [vmem:[#allocation10 + $0x20] sm:$0xff]  }
  0x45   :  { %386 = vmatpush3.bf16.msra.mxu1 %v429_v1  ;;  %398 = vmatpush3.bf16.msra.mxu0 %v431_v7  ;;  %v435_v11 = vld [vmem:[#allocation10 + $0x18] sm:$0xff]   ;;  %v436_v12 = vld [vmem:[#allocation10 + $0x10] sm:$0xff]   ;;  %v437_v13 = vld [vmem:[#allocation10 + $0x8] sm:$0xff]  }
  0x46   :  { %391 = vmatprep.subr.bf16.mxu1 %v584_v0  ;;  %399 = vmatprep.subr.bf16.mxu0 %v584_v0  ;;  %v438_v14 = vld [vmem:[#allocation10] sm:$0xff]  }
  0x47   :  { %v362_v19 = vld [vmem:[%s664_s4] ss:$0 sm:$0xff] }
  0x48   :  { %388 = vmatmul.mubr.msk.bf16.vlgmr.msra.gmra.mxu1 %vm111_vm1, %v99_v3  ;;  %v363_v32 = vld [vmem:[%s666_s6] ss:$0 sm:$0xff] }
  0x49   :  { %392 = vmatpush3.bf16.msra.mxu1 %v430_v4  ;;  %393 = vmatprep.mubr.msk.bf16.mxu1 %vm585_vm0, %v584_v0 }
  0x4a   :  { %400 = vmatpush3.bf16.msra.mxu0 %v432_v8 }
  0x4b   :  { %401 = vmatprep.subr.bf16.mxu0 %v584_v0 }
  0x4e   :  { %402 = vmatpush3.bf16.msra.mxu0 %v433_v9 }
  0x4f   :  { %403 = vmatprep.subr.bf16.mxu0 %v584_v0 }
  0x50   :  { %394 = vmatmul.mubr.msk.bf16.vlgmr.msra.gmra.mxu1 %vm111_vm1, %v97_v6 }
  0x52   :  { %404 = vmatpush3.bf16.msra.mxu0 %v434_v10 }
  0x53   :  { %405 = vmatprep.subr.bf16.mxu0 %v584_v0 }
  0x56   :  { %406 = vmatpush3.bf16.msra.mxu0 %v435_v11 }
  0x57   :  { %407 = vmatprep.subr.bf16.mxu0 %v584_v0 }
  0x5a   :  { %408 = vmatpush3.bf16.msra.mxu0 %v436_v12 }
  0x5b   :  { %409 = vmatprep.subr.bf16.mxu0 %v584_v0 }
  0x5e   :  { %410 = vmatpush3.bf16.msra.mxu0 %v437_v13 }
  0x5f   :  { %411 = vmatprep.subr.bf16.mxu0 %v584_v0 }
  0x62   :  { %412 = vmatpush3.bf16.msra.mxu0 %v438_v14 }
 0x108   :  { %v149_v15 = vpop.f32.mrf.mxu1 }
 0x10a   :  { %v389_v16 = vpop.f32.mrf.mxu1 }
 0x10c   :  { %v152_v17 = vpop.f32.mrf.mxu1 }
 0x10e   :  { %v390_v18 = vpop.f32.mrf.mxu1 }
 0x110   :  { %v198_v20 = vpop.f32.mrf.mxu1 }
 0x111   :  { %v199_v21 = vadd.f32 %v198_v20, %v149_v15 }
 0x112   :  { %v395_v22 = vpop.f32.mrf.mxu1 }
 0x113   :  { %v210_v23 = vadd.f32 %v362_v19, %v199_v21 }
 0x114   :  { %v201_v24 = vpop.f32.mrf.mxu1 }
 0x115   :  { %v212_v25 = vmul.f32 0.70710677, %v210_v23  ;;  %v211_v28 = vmul.f32 0.5, %v210_v23 }
 0x116   :  { %v396_v26 = vpop.f32.mrf.mxu1 }
 0x117   :  { %439 = verf.f32 %v212_v25 }
 0x124   :  { %v440_v27 = vpop.eup %439 }
 0x125   :  { %v214_v29 = vadd.f32 1.0, %v440_v27 }
 0x127   :  { %v215_v30 = vmul.f32 %v214_v29, %v211_v28 }
 0x129   :  { %v233_v31 = vpack.c.bf16 %v215_v30, %v215_v30 }
 0x12b   :  { %414 = vmatmul.mubr.bf16.vlgmr.msra.gmra.mxu0 %v233_v31 }
 0x1eb   :  { %v322_v33 = vpop.f32.mrf.mxu0 }
 0x1ec   :  { %v323_v34 = vadd.f32 %v363_v32, %v322_v33 }
 0x1ed   :  { %v415_v35 = vpop.f32.mrf.mxu0 }
 0x1ee   :  { %v329_v36 = vmul.f32 0.70710677, %v323_v34  ;;  %v328_v40 = vmul.f32 0.5, %v323_v34 }
 0x1ef   :  { %v325_v37 = vpop.f32.mrf.mxu0 }
 0x1f0   :  { %441 = verf.f32 %v329_v36 }
 0x1f1   :  { %v416_v38 = vpop.f32.mrf.mxu0 }
 0x1fd   :  { %v442_v39 = vpop.eup %441 }
 0x1fe   :  { %v331_v41 = vadd.f32 1.0, %v442_v39 }
 0x200   :  { %v332_v42 = vmul.f32 %v331_v41, %v328_v40 }
 0x202   :  { %v333_v43 = vsub.f32 0.0, %v332_v42 }
 0x204   :  { %v334_v44 = vmul.f32 1.442695, %v333_v43 }
 0x206   :  { %443 = vpow2.f32 %v334_v44 }
 0x213   :  { %v444_v45 = vpop.eup %443 }
 0x214   :  { %v336_v46 = vadd.f32 1.0, %v444_v45 }
 0x216   :  { %445 = vrcp.f32 %v336_v46 }
 0x223   :  { %v446_v47 = vpop.eup %445 }
 0x224   :  { %338 = vst [vmem:[#allocation11] sm:$0xff] %v446_v47 }
 0x225   :  { %343 = vsyncadd [#allocation4], 96  ;;  %s586_s4 = smov [#allocation11]  }
 0x226   :  { %s344_s6 = sshll.u32 %s586_s4, 4  ;;  %s345_s6 = int_to_ptr.vmem [resolvable:$true] %s344_s6 }
 0x227   :  { %s547_s10 = scalar_lea.vmem %s345_s6, 32  ;;  %s551_s11 = scalar_lea.vmem %s345_s6, 128 }
 0x228   :  { %p548_p11 = scmp.ne.s32.totalorder %s345_s6, %s547_s10  ;;  %p552_p12 = scmp.lt.s32.totalorder %s345_s6, %s345_s6 }
 0x229   :  { %p553_p13 = scmp.lt.s32.totalorder %s551_s11, %s547_s10 }
 0x22b   :  { %p554_p0 = por %p553_p13, %p552_p12 }
 0x22d   :  { %p555_p1 = pnand %p554_p0, %p548_p11 }
 0x22f   :  { %558 = shalt.err (!%p555_p1)
}
 0x230   :  { %350 = dma.vmem_to_hbm [thread:$0]  %s345_s6, 32, %s667_s7, [#allocation4], %s576_s28, %s576_s28, %s577_s29  }
 0x231   :  { %573 = dma.done.wait [#allocation4], 128  }
 0x232   :  { %574 = vsyncadd [#allocation4], 4294967168 }
 0x233   :  { %354 = vsyncpa [#allocation3], 1 }
 0x234   :  { %355 = vsyncpa [#allocation6], 1 }
 0x235   :  { %356 = vsyncpa [#allocation9], 1 }
 0x236   :  { %357 = vsyncpa [#allocation4], 1 }

</bundles_post_ra>
